<compile_context>
chip_gen: v7x
topology: tpu7x:2x2x1
jax: 0.10.0
libtpu: 0.0.40
codegen_flags: <defaults>
</compile_context>

<pallas_src>
import functools

import jax
import jax.numpy as jnp
from jax.experimental import pallas as pl
from jax.experimental.pallas import tpu as pltpu


# ----------------------------------------------------------------------------
# Pass 1: fused projection (single lane-dense MXU matmul per row block).
#   out_block = [h | emb]_block @ W_big,  W_big = [[W, W@a_wh], [0, a_emb], pad]
#   columns [0:F)   -> Wh
#   columns [F:F+2) -> S   (S[:,0] = Wh1, S[:,1] = Wh2)
# ----------------------------------------------------------------------------
def _proj_kernel(x_ref, w_ref, out_ref):
    out_ref[...] = jnp.dot(
        x_ref[...], w_ref[...],
        preferred_element_type=jnp.float32).astype(out_ref.dtype)


# ----------------------------------------------------------------------------
# Pass 2: flash-style online softmax + aggregation over column tiles.
#   grid = (row_blocks, col_blocks); the column axis is the reduction axis.
# ----------------------------------------------------------------------------
def _flash_kernel(adj_ref, s1_ref, s2t_ref, wh_ref,
                  hp_ref, m_out_ref, l_out_ref,
                  m_sc, l_sc, acc_sc, *, alpha, n_cols):
    k = pl.program_id(1)
    tm, tk = adj_ref.shape

    @pl.when(k == 0)
    def _():
        m_sc[...] = jnp.full_like(m_sc, -jnp.inf)
        l_sc[...] = jnp.zeros_like(l_sc)
        acc_sc[...] = jnp.zeros_like(acc_sc)

    # leaky-relu(Wh1 + Wh2^T) then adjacency mask, fused (no (N,N) const temp).
    e = s1_ref[...] + s2t_ref[...]                    # (tm, tk) f32
    e = jnp.maximum(e, alpha * e)                     # leaky-relu (0 <= alpha <= 1)
    logits = jnp.where(adj_ref[...] > 0, e, -9e15)

    # Out-of-range columns of a partial last block get -inf so they contribute
    # exactly zero probability mass (garbage-proof for N % tk != 0).
    remaining = n_cols - k * tk
    col_valid = jax.lax.broadcasted_iota(jnp.int32, (tm, tk), 1) < remaining
    logits = jnp.where(col_valid, logits, -jnp.inf)

    m_prev = m_sc[...]
    m_new = jnp.maximum(m_prev, jnp.max(logits, axis=1, keepdims=True))
    corr = jnp.exp(m_prev - m_new)
    p = jnp.exp(logits - m_new)                       # (tm, tk) f32
    l_sc[...] = corr * l_sc[...] + jnp.sum(p, axis=1, keepdims=True)

    # Zero padded Wh rows so 0 * garbage can never inject NaN/Inf into acc.
    row_valid = jax.lax.broadcasted_iota(jnp.int32, (tk, 1), 0) < remaining
    wh = jnp.where(row_valid, wh_ref[...], 0)
    acc_sc[...] = corr * acc_sc[...] + jnp.dot(
        p.astype(wh.dtype), wh, preferred_element_type=jnp.float32)
    m_sc[...] = m_new

    @pl.when(k == pl.num_programs(1) - 1)
    def _():
        inv_l = pl.reciprocal(l_sc[...], approx=True)          # EUP reciprocal
        hp_ref[...] = (acc_sc[...] * inv_l).astype(hp_ref.dtype)
        m_out_ref[...] = m_sc[...]
        l_out_ref[...] = l_sc[...]


# ----------------------------------------------------------------------------
# Pass 3 (optional): materialize the normalized attention matrix from row stats.
#   Fully parallel over (row_blocks, col_blocks).
# ----------------------------------------------------------------------------
def _attn_mat_kernel(adj_ref, s1_ref, s2t_ref, m_ref, l_ref, attn_ref, *, alpha):
    e = s1_ref[...] + s2t_ref[...]
    e = jnp.maximum(e, alpha * e)
    logits = jnp.where(adj_ref[...] > 0, e, -9e15)
    p = jnp.exp(logits - m_ref[...])
    attn_ref[...] = (p * pl.reciprocal(l_ref[...], approx=True)).astype(attn_ref.dtype)


# ----------------------------------------------------------------------------
# Wrapper
# ----------------------------------------------------------------------------
def gat_forward(h, adj, emb, W, a, *, alpha,
                block_rows=128,
                block_cols=128,
                return_attention=True,
                matmul_dtype=jnp.float32,
                attn_dtype=jnp.float32,
                vmem_limit_bytes=48 * 1024 * 1024):
    """Pallas implementation of GraphAttentionLayer.forward (eval mode).

    matmul_dtype=jnp.bfloat16 narrows MXU operands (f32 accumulation) and makes
    Wh travel HBM<->VMEM at half width; f32 default keeps parity with PyTorch.
    Per-generation tuning: raise block_rows/block_cols to 256-512 and
    vmem_limit_bytes to ~96 MiB on v5e/v6e; keep defaults on v7x (64 MiB VMEM).
    """
    N, in_features = h.shape
    F = W.shape[1]
    assert emb.shape == (N, F), "emb feature dim must equal out_features (concat=True)"
    assert a.shape[0] == 4 * F, "a must have 2*(out+out) rows (concat=True)"
    assert 0.0 <= alpha <= 1.0, "leaky-relu slope folded as vmax requires alpha in [0,1]"

    # ---- fold the attention projection into the main matmul -----------------
    #   [h | emb] @ [[W, W @ a_wh], [0, a_emb]]  ->  [Wh | S]
    a_flat = a.reshape(-1).astype(jnp.float32)
    a_wh = jnp.stack([a_flat[0 * F:1 * F], a_flat[2 * F:3 * F]], axis=1)   # (F, 2)
    a_emb = jnp.stack([a_flat[1 * F:2 * F], a_flat[3 * F:4 * F]], axis=1)  # (F, 2)

    Wf = W.astype(jnp.float32)
    w_top = jnp.concatenate([Wf, Wf @ a_wh], axis=1)                       # (Fin, F+2)
    w_bot = jnp.concatenate([jnp.zeros((F, F), jnp.float32), a_emb], axis=1)
    w_big = jnp.concatenate([w_top, w_bot], axis=0)                        # (Fin+F, F+2)
    P = max(128, ((F + 2 + 127) // 128) * 128)                             # lane-dense pad
    w_big = jnp.pad(w_big, ((0, 0), (0, P - (F + 2))))

    # Cast MXU operands in the wrapper (DMA travels at the narrow width).
    x_cat = jnp.concatenate(
        [h.astype(jnp.float32), emb.astype(jnp.float32)], axis=1).astype(matmul_dtype)
    w_big = w_big.astype(matmul_dtype)

    tm = N if N <= block_rows else block_rows
    tk = N if N <= block_cols else block_cols
    row_grid = pl.cdiv(N, tm)
    col_grid = pl.cdiv(N, tk)

    # ---- pass 1: [Wh | S] ----------------------------------------------------
    proj = pl.pallas_call(
        _proj_kernel,
        grid=(row_grid,),
        in_specs=[
            pl.BlockSpec((tm, in_features + F), lambda i: (i, 0)),   # [h | emb] block
            pl.BlockSpec((in_features + F, P), lambda i: (0, 0)),    # W_big (resident)
        ],
        out_specs=pl.BlockSpec((tm, P), lambda i: (i, 0)),
        out_shape=jax.ShapeDtypeStruct((N, P), matmul_dtype),
        compiler_params=pltpu.CompilerParams(
            dimension_semantics=("parallel",),
            vmem_limit_bytes=vmem_limit_bytes),
    )(x_cat, w_big)

    wh = proj[:, :F]                                  # (N, F) in matmul_dtype
    s = proj[:, F:F + 2].astype(jnp.float32)          # elementwise math stays f32
    s1 = s[:, 0:1]                                    # (N, 1)  Wh1
    s2t = s[:, 1:2].T                                 # (1, N)  Wh2^T

    # adjacency only feeds a `> 0` compare: ship it as int8 (4x less HBM read).
    adj_i8 = (adj > 0).astype(jnp.int8)

    # ---- pass 2: flash (online softmax) aggregation ---------------------------
    h_prime, m_rows, l_rows = pl.pallas_call(
        functools.partial(_flash_kernel, alpha=alpha, n_cols=N),
        grid=(row_grid, col_grid),
        in_specs=[
            pl.BlockSpec((tm, tk), lambda i, k: (i, k)),     # adj block (int8)
            pl.BlockSpec((tm, 1), lambda i, k: (i, 0)),      # s1 row block
            pl.BlockSpec((1, tk), lambda i, k: (0, k)),      # s2^T column block
            pl.BlockSpec((tk, F), lambda i, k: (k, 0)),      # Wh column block
        ],
        out_specs=(
            pl.BlockSpec((tm, F), lambda i, k: (i, 0)),      # h_prime (revisited)
            pl.BlockSpec((tm, 1), lambda i, k: (i, 0)),      # row max  m
            pl.BlockSpec((tm, 1), lambda i, k: (i, 0)),      # row sum  l
        ),
        out_shape=(
            jax.ShapeDtypeStruct((N, F), jnp.float32),
            jax.ShapeDtypeStruct((N, 1), jnp.float32),
            jax.ShapeDtypeStruct((N, 1), jnp.float32),
        ),
        scratch_shapes=[
            pltpu.VMEM((tm, 1), jnp.float32),    # running max
            pltpu.VMEM((tm, 1), jnp.float32),    # running sum
            pltpu.VMEM((tm, F), jnp.float32),    # accumulator
        ],
        compiler_params=pltpu.CompilerParams(
            dimension_semantics=("parallel", "arbitrary"),
            vmem_limit_bytes=vmem_limit_bytes),
    )(adj_i8, s1, s2t, wh)

    if not return_attention:
        return h_prime

    # ---- pass 3: normalized attention matrix (only when requested) -----------
    attention = pl.pallas_call(
        functools.partial(_attn_mat_kernel, alpha=alpha),
        grid=(row_grid, col_grid),
        in_specs=[
            pl.BlockSpec((tm, tk), lambda i, k: (i, k)),     # adj block (int8)
            pl.BlockSpec((tm, 1), lambda i, k: (i, 0)),      # s1
            pl.BlockSpec((1, tk), lambda i, k: (0, k)),      # s2^T
            pl.BlockSpec((tm, 1), lambda i, k: (i, 0)),      # row max m
            pl.BlockSpec((tm, 1), lambda i, k: (i, 0)),      # row sum l
        ],
        out_specs=pl.BlockSpec((tm, tk), lambda i, k: (i, k)),
        out_shape=jax.ShapeDtypeStruct((N, N), attn_dtype),
        compiler_params=pltpu.CompilerParams(
            dimension_semantics=("parallel", "parallel"),
            vmem_limit_bytes=vmem_limit_bytes),
    )(adj_i8, s1, s2t, m_rows, l_rows)

    return h_prime, attention


# ----------------------------------------------------------------------------
# Helpers / self-test
# ----------------------------------------------------------------------------
def _xavier_uniform(key, shape, gain):
    fan_in, fan_out = shape[0], shape[1]
    bound = gain * jnp.sqrt(6.0 / (fan_in + fan_out))
    return jax.random.uniform(key, shape, jnp.float32, -bound, bound)


def _reference(h, adj, emb, W, a, alpha):
    """Pure-JAX reference mirroring the PyTorch forward (eval mode)."""
    Wh = h @ W
    WH_E = jnp.concatenate([Wh, emb], axis=-1)
    dim = WH_E.shape[1]
    Wh1 = WH_E @ a[:dim, :]
    Wh2 = WH_E @ a[dim:, :]
    e = Wh1 + Wh2.T
    e = jnp.where(e > 0, e, alpha * e)
    att = jnp.where(adj > 0, e, jnp.full_like(e, -9e15))
    att = jax.nn.softmax(att, axis=1)
    return att @ Wh, att


if __name__ == "__main__":
    # Module config (concat=True => n = out_features => a has 4*out rows,
    # which forces emb feature dim == out_features).
    N = 8
    in_features = 16
    out_features = 32
    alpha = 0.2
    dropout = 0.5  # unused in eval mode

    key = jax.random.PRNGKey(0)
    k_w, k_a, k_h, k_adj, k_emb = jax.random.split(key, 5)

    W = _xavier_uniform(k_w, (in_features, out_features), gain=1.414)
    a = _xavier_uniform(k_a, (4 * out_features, 1), gain=1.414)

    h = jax.random.normal(k_h, (N, in_features), jnp.float32)
    emb = jax.random.normal(k_emb, (N, out_features), jnp.float32)
    adj = (jax.random.uniform(k_adj, (N, N)) > 0.5).astype(jnp.float32)
    adj = jnp.maximum(adj, jnp.eye(N, dtype=jnp.float32))  # self-loops

    h_prime, attention = gat_forward(h, adj, emb, W, a, alpha=alpha)
    jax.block_until_ready((h_prime, attention))

    ref_hp, ref_att = _reference(h, adj, emb, W, a, alpha)
    # Tolerances accommodate the EUP approximate reciprocal in the softmax.
    assert jnp.allclose(attention, ref_att, atol=2e-3, rtol=2e-3), "attention mismatch"
    assert jnp.allclose(h_prime, ref_hp, atol=2e-3, rtol=2e-3), "h_prime mismatch"

    # Hot path: skip the (N, N) attention materialization entirely.
    hp_only = gat_forward(h, adj, emb, W, a, alpha=alpha, return_attention=False)
    jax.block_until_ready(hp_only)
    assert jnp.allclose(hp_only, ref_hp, atol=2e-3, rtol=2e-3), "hp_only mismatch"

    # bf16 MXU-operand path (f32 accumulation) — loose smoke-test tolerance.
    hp_bf16 = gat_forward(h, adj, emb, W, a, alpha=alpha,
                          return_attention=False, matmul_dtype=jnp.bfloat16)
    jax.block_until_ready(hp_bf16)
    assert bool(jnp.all(jnp.isfinite(hp_bf16))), "bf16 path produced non-finite values"
    assert jnp.allclose(hp_bf16, ref_hp, atol=0.25, rtol=0.1), "bf16 h_prime mismatch"

    print("KERNEL_OK")
</pallas_src>

<mosaic_0001>
module attributes {stable_mosaic.version = 11 : i64} {
  func.func @_proj_kernel(%arg0: i32, %arg1: memref<8x48xf32, #tpu.memory_space<vmem>>, %arg2: memref<48x128xf32, #tpu.memory_space<vmem>>, %arg3: memref<8x128xf32, #tpu.memory_space<vmem>>) attributes {dimension_semantics = [#tpu.dimension_semantics<parallel>], iteration_bounds = array<i64: 1>, scalar_prefetch = 0 : i64, scratch_operands = 0 : i64, tpu.core_type = #tpu.core_type<tc>, window_params = [{transform_indices = @transform_0, window_bounds = array<i64: 8, 48>}, {pipeline_mode = #tpu.pipeline_mode<synchronous>, transform_indices = @transform_1, window_bounds = array<i64: 48, 128>}, {transform_indices = @transform_2, window_bounds = array<i64: 8, 128>}]} {
    %c0 = arith.constant 0 : index
    %c0_0 = arith.constant 0 : index
    %0 = vector.load %arg1[%c0, %c0_0] : memref<8x48xf32, #tpu.memory_space<vmem>>, vector<8x48xf32>
    %c0_1 = arith.constant 0 : index
    %c0_2 = arith.constant 0 : index
    %1 = vector.load %arg2[%c0_1, %c0_2] : memref<48x128xf32, #tpu.memory_space<vmem>>, vector<48x128xf32>
    %cst = arith.constant dense<0.000000e+00> : vector<8x128xf32>
    %2 = tpu.matmul %0, %1, %cst {dimension_numbers = #tpu.dot_dimension_numbers<[1], [0], [0], [1], [0, 0, 1, 1], [], []>} : vector<8x48xf32>, vector<48x128xf32>, vector<8x128xf32> -> vector<8x128xf32>
    %c0_3 = arith.constant 0 : index
    %c0_4 = arith.constant 0 : index
    %3 = vector.load %arg3[%c0_3, %c0_4] : memref<8x128xf32, #tpu.memory_space<vmem>>, vector<8x128xf32>
    tpu.vector_store %arg3[%c0_3, %c0_4], %2 {strides = array<i32>} : memref<8x128xf32, #tpu.memory_space<vmem>>, vector<8x128xf32>,
    return
  }
  func.func @transform_0(%arg0: i32) -> (i32, i32) {
    %c0_i32 = arith.constant 0 : i32
    %c0_i32_0 = arith.constant 0 : i32
    return %arg0, %c0_i32 : i32, i32
  }
  func.func @transform_1(%arg0: i32) -> (i32, i32) {
    %c0_i32 = arith.constant 0 : i32
    %c0_i32_0 = arith.constant 0 : i32
    %c0_i32_1 = arith.constant 0 : i32
    return %c0_i32, %c0_i32_0 : i32, i32
  }
  func.func @transform_2(%arg0: i32) -> (i32, i32) {
    %c0_i32 = arith.constant 0 : i32
    %c0_i32_0 = arith.constant 0 : i32
    return %arg0, %c0_i32 : i32, i32
  }
}

</mosaic_0001>

<bundles_post_ra>
// kernel: tpu_custom_call.1
= control target key start
LH: loop header
LB: loop body
LE: loop exit
PB: predicated region body
PF: predicated region fallthrough
CT: control target
= control target key end

     0   :  { %7 = vsyncpa [#allocation3], 0  ;;  %s314_s0 = inlined_call_operand.hbm [shape: f32[8,48], index: 0, kind: input, shape index: {}]   ;;  %s315_s1 = inlined_call_operand.hbm [shape: f32[48,128], index: 1, kind: input, shape index: {}]   ;;  %s316_s2 = inlined_call_operand.hbm [shape: f32[8,128], index: 2, kind: output, shape index: {}]  }
   0x1   :  { %8 = vsyncpa [#allocation6], 0 }
   0x2   :  { %9 = vsyncpa [#allocation4], 0  ;;  %s248_s9 = smov [#allocation2]   ;;  %s249_s11 = smov [#allocation5]  }
   0x3   :  { %s16_s10 = sshll.u32 %s248_s9, 4  ;;  %s25_s12 = sshll.u32 %s249_s11, 4  ;;  %s17_s10 = int_to_ptr.vmem [resolvable:$true] %s16_s10  ;;  %s271_s12 = int_to_ptr.vmem [resolvable:$true] %s25_s12 }
   0x4   :  { %s176_s15 = scalar_lea.hbm %s314_s0, 128 }
   0x5   :  { %p177_p0 = scmp.ne.s32.totalorder %s314_s0, %s176_s15  ;;  %p180_p1 = scmp.lt.u32.totalorder %s176_s15, %s314_s0 }
   0x7   :  { %p182_p2 = pnand %p180_p1, %p177_p0 }
   0x9   :  { %185 = shalt.err (!%p182_p2)
}
   0xa   :  { %s186_s20 = scalar_lea.vmem %s17_s10, 128  ;;  %p191_p4 = scmp.lt.s32.totalorder %s17_s10, %s17_s10 }
   0xb   :  { %p187_p3 = scmp.ne.s32.totalorder %s17_s10, %s186_s20  ;;  %p192_p5 = scmp.lt.s32.totalorder %s186_s20, %s186_s20 }
   0xd   :  { %p193_p6 = por %p192_p5, %p191_p4 }
   0xf   :  { %p194_p7 = pnand %p193_p6, %p187_p3 }
  0x11   :  { %197 = shalt.err (!%p194_p7)
}
  0x12   :  { %19 = dma.hbm_to_vmem [thread:$0]  %s314_s0, 128, %s17_s10, [#allocation3]  }
  0x13   :  { %s198_s25 = scalar_lea.hbm %s315_s1, 768 }
  0x14   :  { %p199_p8 = scmp.ne.s32.totalorder %s315_s1, %s198_s25  ;;  %p202_p9 = scmp.lt.u32.totalorder %s198_s25, %s315_s1 }
  0x16   :  { %p204_p10 = pnand %p202_p9, %p199_p8 }
  0x18   :  { %207 = shalt.err (!%p204_p10)
}
  0x19   :  { %s208_s30 = scalar_lea.vmem %s271_s12, 768  ;;  %p213_p12 = scmp.lt.s32.totalorder %s271_s12, %s271_s12 }
  0x1a   :  { %p209_p11 = scmp.ne.s32.totalorder %s271_s12, %s208_s30  ;;  %p214_p13 = scmp.lt.s32.totalorder %s208_s30, %s208_s30 }
  0x1c   :  { %p215_p0 = por %p214_p13, %p213_p12 }
  0x1e   :  { %p216_p1 = pnand %p215_p0, %p209_p11 }
  0x20   :  { %219 = shalt.err (!%p216_p1)
}
  0x21   :  { %s250_s0 = smov 128   ;;  %s251_s3 = smov 8  }
  0x22   :  { %31 = dma.hbm_to_vmem [thread:$0]  %s315_s1, 768, %s271_s12, [#allocation6], %s250_s0, %s250_s0, %s251_s3  }
  0x23   :  { %242 = dma.done.wait [#allocation3], 128  }
  0x24   :  { %243 = vsyncadd [#allocation3], 4294967168 }
  0x25   :  { %244 = dma.done.wait [#allocation6], 768  }
  0x26   :  { %245 = vsyncadd [#allocation6], 4294966528  ;;  %v252_v0 = vmov 0.0|0.0   ;;  %vm253_vm0 = vmmov 0   ;;  %v254_v1 = vmov 0.0   ;;  %v39_v2 = vld [vmem:[#allocation5] sm:$0xff] }
  0x27   :  { %159 = vmatprep.subr.bf16.mxu0 %v252_v0  ;;  %156 = vmatprep.mubr.msk.f32.mxu0 %vm253_vm0, %v254_v1  ;;  %v40_v3 = vld [vmem:[#allocation5 + $0x8] sm:$0xff]  ;;  %v41_v4 = vld [vmem:[#allocation5 + $0x10] sm:$0xff]  ;;  %v42_v6 = vld [vmem:[#allocation5 + $0x18] sm:$0xff]  ;;  %vm45_vm1 = vcmask 392192   ;;  %s255_s1 = smov [#allocation7]  }
  0x28   :  { %v160_v5 = vpack.c.bf16 %v40_v3, %v39_v2  ;;  %v163_v7 = vpack.c.bf16 %v42_v6, %v41_v4  ;;  %v43_v8 = vld [vmem:[#allocation5 + $0x20] sm:$0xff]  ;;  %v44_v9 = vld [vmem:[#allocation5 + $0x28] sm:$0xff]  ;;  %v38_v11 = vld [vmem:[#allocation2] sm:$0xff]  ;;  %s126_s6 = sshll.u32 %s255_s1, 4  ;;  %s127_s6 = int_to_ptr.vmem [resolvable:$true] %s126_s6 }
  0x29   :  { %v166_v10 = vpack.c.bf16 %v44_v9, %v43_v8  ;;  %s220_s7 = scalar_lea.vmem %s127_s6, 128  ;;  %p225_p3 = scmp.lt.s32.totalorder %s127_s6, %s127_s6 }
  0x2a   :  { %161 = vmatpush3.bf16.msra.mxu0 %v160_v5  ;;  %p221_p2 = scmp.ne.s32.totalorder %s127_s6, %s220_s7  ;;  %p226_p4 = scmp.lt.s32.totalorder %s220_s7, %s220_s7 }
  0x2b   :  { %162 = vmatprep.subr.bf16.mxu0 %v252_v0 }
  0x2c   :  { %p227_p5 = por %p226_p4, %p225_p3 }
  0x2e   :  { %164 = vmatpush3.bf16.msra.mxu0 %v163_v7  ;;  %p228_p6 = pnand %p227_p5, %p221_p2 }
  0x2f   :  { %165 = vmatprep.subr.bf16.mxu0 %v252_v0 }
  0x32   :  { %167 = vmatpush3.bf16.msra.mxu0 %v166_v10 }
  0x35   :  { %157 = vmatmul.mubr.msk.f32.vlgmr.msra.gmra.mrb[0].mxu0 %vm45_vm1, %v38_v11 }
 0x108   :  { %v115_v12 = vpop.f32.mrb[0].mxu0 }
 0x109   :  { %119 = vst [vmem:[#allocation7] sm:$0xff] %v115_v12  ;;  %v158_v13 = vpop.f32.mrb[1].mxu0 }
 0x10a   :  { %231 = shalt.err (!%p228_p6)
}
 0x10b   :  { %s232_s10 = scalar_lea.hbm %s316_s2, 128 }
 0x10c   :  { %p233_p7 = scmp.ne.s32.totalorder %s316_s2, %s232_s10  ;;  %p236_p8 = scmp.lt.u32.totalorder %s232_s10, %s316_s2 }
 0x10e   :  { %p238_p9 = pnand %p236_p8, %p233_p7 }
 0x110   :  { %241 = shalt.err (!%p238_p9)
}
 0x111   :  { %129 = dma.vmem_to_hbm [thread:$0]  %s127_s6, 128, %s316_s2, [#allocation4]  }
 0x112   :  { %246 = dma.done.wait [#allocation4], 128  }
 0x113   :  { %247 = vsyncadd [#allocation4], 4294967168 }
 0x114   :  { %133 = vsyncpa [#allocation3], 1 }
 0x115   :  { %134 = vsyncpa [#allocation6], 1 }
 0x116   :  { %135 = vsyncpa [#allocation4], 1 }

</bundles_post_ra>
